<compile_context>
chip_gen: v7x
topology: tpu7x:2x2x1
jax: 0.10.0
libtpu: 0.0.40
codegen_flags: <defaults>
</compile_context>

<pallas_src>
import jax
import jax.numpy as jnp
from jax.experimental import pallas as pl
from jax.experimental.pallas import tpu as pltpu


def mlp_classifier_kernel(u_ref, v_ref, w1_ref, b1_ref, w2_ref, b2_ref, out_ref):
    u = u_ref[...]  # (TB, E) f32
    v = v_ref[...]  # (TB, E) f32

    # Feature construction on the VPU in f32; vec = [u, v, |u-v|, u*v] -> (TB, 4E).
    vec = jnp.concatenate([u, v, jnp.abs(u - v), u * v], axis=1)

    # Dropout with p=0 (module default / eval) is the identity.
    # TODO(synk): training-time dropout with p>0 would need pltpu.prng_* here.

    # inputLayer + ReLU: matmul in the weights' compute dtype (bf16 on v6e/v7x,
    # f32 on v5e), f32 accumulation.  astype is a no-op in the f32 case.
    h = jnp.dot(vec.astype(w1_ref.dtype), w1_ref[...],
                preferred_element_type=jnp.float32) + b1_ref[...]
    h = jnp.maximum(h, 0.0)

    # outputLayer: un-padded narrow (TB, T) result, f32 accumulation.
    logits = jnp.dot(h.astype(w2_ref.dtype), w2_ref[...],
                     preferred_element_type=jnp.float32) + b2_ref[...]
    out_ref[...] = logits.astype(out_ref.dtype)


def _default_compute_dtype():
    """bf16 on v6e/v7x (native bf16 VPU, halves weight bytes); f32 on older gens."""
    try:
        kind = jax.devices()[0].device_kind.lower()
    except Exception:
        return jnp.bfloat16
    for old in ("v5 lite", "v5lite", "v5e", "v4", "v3", "v2"):
        if old in kind:
            return jnp.float32
    return jnp.bfloat16


def prepare_params(w1, b1, w2, b2, compute_dtype=None):
    """One-time parameter preparation (call at init, NOT per forward call).

    w1: (4*E, H), b1: (1, H), w2: (H, T), b2: (1, T), stored (in, out).
    Weights are cast to the MXU compute dtype once; biases stay f32.
    """
    if compute_dtype is None:
        compute_dtype = _default_compute_dtype()
    return {
        "w1": w1.astype(compute_dtype),
        "b1": b1.astype(jnp.float32),
        "w2": w2.astype(compute_dtype),
        "b2": b2.astype(jnp.float32),
    }


def _pick_batch_tile(B, block_b):
    """Batch tile: multiple of 8, big (amortize ~0.35us/step), >=2 grid steps
    when B allows (v7x has 2 TensorCores), and dividing B when possible so no
    jnp.pad copy / post-kernel slice is needed."""
    tb = max(8, (min(block_b, B) // 8) * 8)
    if B >= 16 and pl.cdiv(B, tb) < 2:
        tb = max(8, (tb // 2 // 8) * 8)
    if B % tb != 0:
        cand = tb
        while cand >= max(8, tb // 4):
            if B % cand == 0:
                return cand
            cand -= 8
    return tb


def mlp_classifier_forward(u, v, params, *, block_b=512):
    """Returns (logits, p) mirroring MLP_classifier.forward.

    u, v   : (B, E) encoder outputs (f32).
    params : dict from prepare_params().
    p is None (a plain-tensor encoder, not a tuple-returning one, is assumed).
    """
    w1, b1, w2, b2 = params["w1"], params["b1"], params["w2"], params["b2"]
    B, E = u.shape
    K, H = w1.shape
    T = w2.shape[1]
    assert K == 4 * E
    assert b1.shape == (1, H)
    assert w2.shape == (H, T)
    assert b2.shape == (1, T)

    TB = _pick_batch_tile(B, block_b)
    B_pad = pl.cdiv(B, TB) * TB
    if B_pad != B:
        # Only hit for ragged batch sizes no multiple-of-8 tile divides.
        pad = B_pad - B
        u = jnp.pad(u, ((0, pad), (0, 0)))
        v = jnp.pad(v, ((0, pad), (0, 0)))

    grid = (B_pad // TB,)

    logits = pl.pallas_call(
        mlp_classifier_kernel,
        out_shape=jax.ShapeDtypeStruct((B_pad, T), jnp.float32),
        grid=grid,
        in_specs=[
            pl.BlockSpec((TB, E), lambda i: (i, 0)),   # u tile (pipelined)
            pl.BlockSpec((TB, E), lambda i: (i, 0)),   # v tile (pipelined)
            pl.BlockSpec((K, H), lambda i: (0, 0)),    # w1: VMEM-resident
            pl.BlockSpec((1, H), lambda i: (0, 0)),    # b1: VMEM-resident
            pl.BlockSpec((H, T), lambda i: (0, 0)),    # w2: VMEM-resident
            pl.BlockSpec((1, T), lambda i: (0, 0)),    # b2: VMEM-resident
        ],
        out_specs=pl.BlockSpec((TB, T), lambda i: (i, 0)),
        compiler_params=pltpu.CompilerParams(
            dimension_semantics=("parallel",),
        ),
    )(u, v, w1, b1, w2, b2)

    if B_pad != B:
        logits = logits[:B]
    # TODO(synk): the `p` path (tuple-returning encoder) has no encoder here.
    return logits, None


def reference_forward(u, v, params):
    """Pure-JAX reference using the same prepared weights / accumulation scheme."""
    w1, b1, w2, b2 = params["w1"], params["b1"], params["w2"], params["b2"]
    vec = jnp.concatenate([u, v, jnp.abs(u - v), u * v], axis=1)
    h = jnp.dot(vec.astype(w1.dtype), w1,
                preferred_element_type=jnp.float32) + b1
    h = jnp.maximum(h, 0.0)
    return jnp.dot(h.astype(w2.dtype), w2,
                   preferred_element_type=jnp.float32) + b2


if __name__ == "__main__":
    # Shapes consistent with the module (small, but a big enough batch to
    # exercise the batch grid / megacore sharding): encoder.output_size E = 32
    # -> 4*E = 128, hidden_size H = 128, num_layers = 1, len(tag_vocab) T = 16,
    # batch B = 256 (-> TB = 128, 2 grid steps).
    B, E, H, T = 256, 32, 128, 16

    key = jax.random.PRNGKey(0)
    ku, kv, kw1, kb1, kw2, kb2 = jax.random.split(key, 6)

    # "Encoder outputs" for sentence1 / sentence2.
    u = jax.random.normal(ku, (B, E), dtype=jnp.float32)
    v = jax.random.normal(kv, (B, E), dtype=jnp.float32)

    # Deterministic parameter init (uniform, roughly nn.Linear's scale).
    lim1 = 1.0 / (4 * E) ** 0.5
    lim2 = 1.0 / H ** 0.5
    w1 = jax.random.uniform(kw1, (4 * E, H), jnp.float32, -lim1, lim1)
    b1 = jax.random.uniform(kb1, (1, H), jnp.float32, -lim1, lim1)
    w2 = jax.random.uniform(kw2, (H, T), jnp.float32, -lim2, lim2)
    b2 = jax.random.uniform(kb2, (1, T), jnp.float32, -lim2, lim2)

    # One-time weight prep (cast to per-generation compute dtype).
    params = prepare_params(w1, b1, w2, b2)

    logits, p = mlp_classifier_forward(u, v, params)
    logits = jax.block_until_ready(logits)

    ref = reference_forward(u, v, params)
    assert logits.shape == (B, T)
    assert p is None
    assert jnp.allclose(logits, ref, atol=1e-2, rtol=1e-2), (
        "mismatch vs reference; max abs diff = "
        f"{float(jnp.max(jnp.abs(logits - ref)))}"
    )

    print("KERNEL_OK")
</pallas_src>

<mosaic_0001>
module attributes {stable_mosaic.version = 11 : i64} {
  func.func @mlp_classifier_kernel(%arg0: i32, %arg1: memref<128x32xf32, #tpu.memory_space<vmem>>, %arg2: memref<128x32xf32, #tpu.memory_space<vmem>>, %arg3: memref<128x128xbf16, #tpu.memory_space<vmem>>, %arg4: memref<1x128xf32, #tpu.memory_space<vmem>>, %arg5: memref<128x16xbf16, #tpu.memory_space<vmem>>, %arg6: memref<1x16xf32, #tpu.memory_space<vmem>>, %arg7: memref<128x16xf32, #tpu.memory_space<vmem>>) attributes {dimension_semantics = [#tpu.dimension_semantics<parallel>], iteration_bounds = array<i64: 2>, scalar_prefetch = 0 : i64, scratch_operands = 0 : i64, tpu.core_type = #tpu.core_type<tc>, window_params = [{transform_indices = @transform_0, window_bounds = array<i64: 128, 32>}, {transform_indices = @transform_1, window_bounds = array<i64: 128, 32>}, {pipeline_mode = #tpu.pipeline_mode<synchronous>, transform_indices = @transform_2, window_bounds = array<i64: 128, 128>}, {pipeline_mode = #tpu.pipeline_mode<synchronous>, transform_indices = @transform_3, window_bounds = array<i64: 1, 128>}, {pipeline_mode = #tpu.pipeline_mode<synchronous>, transform_indices = @transform_4, window_bounds = array<i64: 128, 16>}, {pipeline_mode = #tpu.pipeline_mode<synchronous>, transform_indices = @transform_5, window_bounds = array<i64: 1, 16>}, {transform_indices = @transform_6, window_bounds = array<i64: 128, 16>}]} {
    %c0 = arith.constant 0 : index
    %c0_0 = arith.constant 0 : index
    %0 = vector.load %arg1[%c0, %c0_0] : memref<128x32xf32, #tpu.memory_space<vmem>>, vector<128x32xf32>
    %c0_1 = arith.constant 0 : index
    %c0_2 = arith.constant 0 : index
    %1 = vector.load %arg2[%c0_1, %c0_2] : memref<128x32xf32, #tpu.memory_space<vmem>>, vector<128x32xf32>
    %2 = arith.subf %0, %1 : vector<128x32xf32>
    %3 = math.absf %2 : vector<128x32xf32>
    %4 = arith.mulf %0, %1 : vector<128x32xf32>
    %5 = tpu.concatenate %0, %1, %3, %4 in 1 : vector<128x32xf32>, vector<128x32xf32>, vector<128x32xf32>, vector<128x32xf32> -> vector<128x128xf32>
    %6 = arith.truncf %5 : vector<128x128xf32> to vector<128x128xbf16>
    %c0_3 = arith.constant 0 : index
    %c0_4 = arith.constant 0 : index
    %7 = vector.load %arg3[%c0_3, %c0_4] : memref<128x128xbf16, #tpu.memory_space<vmem>>, vector<128x128xbf16>
    %cst = arith.constant dense<0.000000e+00> : vector<128x128xf32>
    %8 = tpu.matmul %6, %7, %cst {dimension_numbers = #tpu.dot_dimension_numbers<[1], [0], [0], [1], [0, 0, 1, 1], [], []>} : vector<128x128xbf16>, vector<128x128xbf16>, vector<128x128xf32> -> vector<128x128xf32>
    %c0_5 = arith.constant 0 : index
    %c0_6 = arith.constant 0 : index
    %9 = vector.load %arg4[%c0_5, %c0_6] : memref<1x128xf32, #tpu.memory_space<vmem>>, vector<1x128xf32>
    %10 = vector.broadcast %9 : vector<1x128xf32> to vector<128x128xf32>
    %11 = arith.addf %8, %10 : vector<128x128xf32>
    %cst_7 = arith.constant 0.000000e+00 : f32
    %12 = vector.broadcast %cst_7 : f32 to vector<128x128xf32>
    %13 = arith.maximumf %11, %12 : vector<128x128xf32>
    %14 = arith.truncf %13 : vector<128x128xf32> to vector<128x128xbf16>
    %c0_8 = arith.constant 0 : index
    %c0_9 = arith.constant 0 : index
    %15 = vector.load %arg5[%c0_8, %c0_9] : memref<128x16xbf16, #tpu.memory_space<vmem>>, vector<128x16xbf16>
    %cst_10 = arith.constant dense<0.000000e+00> : vector<128x16xf32>
    %16 = tpu.matmul %14, %15, %cst_10 {dimension_numbers = #tpu.dot_dimension_numbers<[1], [0], [0], [1], [0, 0, 1, 1], [], []>} : vector<128x128xbf16>, vector<128x16xbf16>, vector<128x16xf32> -> vector<128x16xf32>
    %c0_11 = arith.constant 0 : index
    %c0_12 = arith.constant 0 : index
    %17 = vector.load %arg6[%c0_11, %c0_12] : memref<1x16xf32, #tpu.memory_space<vmem>>, vector<1x16xf32>
    %18 = vector.broadcast %17 : vector<1x16xf32> to vector<128x16xf32>
    %19 = arith.addf %16, %18 : vector<128x16xf32>
    %c0_13 = arith.constant 0 : index
    %c0_14 = arith.constant 0 : index
    %20 = vector.load %arg7[%c0_13, %c0_14] : memref<128x16xf32, #tpu.memory_space<vmem>>, vector<128x16xf32>
    tpu.vector_store %arg7[%c0_13, %c0_14], %19 {strides = array<i32>} : memref<128x16xf32, #tpu.memory_space<vmem>>, vector<128x16xf32>,
    return
  }
  func.func @transform_0(%arg0: i32) -> (i32, i32) {
    %c0_i32 = arith.constant 0 : i32
    %c0_i32_0 = arith.constant 0 : i32
    return %arg0, %c0_i32 : i32, i32
  }
  func.func @transform_1(%arg0: i32) -> (i32, i32) {
    %c0_i32 = arith.constant 0 : i32
    %c0_i32_0 = arith.constant 0 : i32
    return %arg0, %c0_i32 : i32, i32
  }
  func.func @transform_2(%arg0: i32) -> (i32, i32) {
    %c0_i32 = arith.constant 0 : i32
    %c0_i32_0 = arith.constant 0 : i32
    %c0_i32_1 = arith.constant 0 : i32
    return %c0_i32, %c0_i32_0 : i32, i32
  }
  func.func @transform_3(%arg0: i32) -> (i32, i32) {
    %c0_i32 = arith.constant 0 : i32
    %c0_i32_0 = arith.constant 0 : i32
    %c0_i32_1 = arith.constant 0 : i32
    return %c0_i32, %c0_i32_0 : i32, i32
  }
  func.func @transform_4(%arg0: i32) -> (i32, i32) {
    %c0_i32 = arith.constant 0 : i32
    %c0_i32_0 = arith.constant 0 : i32
    %c0_i32_1 = arith.constant 0 : i32
    return %c0_i32, %c0_i32_0 : i32, i32
  }
  func.func @transform_5(%arg0: i32) -> (i32, i32) {
    %c0_i32 = arith.constant 0 : i32
    %c0_i32_0 = arith.constant 0 : i32
    %c0_i32_1 = arith.constant 0 : i32
    return %c0_i32, %c0_i32_0 : i32, i32
  }
  func.func @transform_6(%arg0: i32) -> (i32, i32) {
    %c0_i32 = arith.constant 0 : i32
    %c0_i32_0 = arith.constant 0 : i32
    return %arg0, %c0_i32 : i32, i32
  }
}

</mosaic_0001>

<bundles_post_ra>
// kernel: tpu_custom_call.1
= control target key start
LH: loop header
LB: loop body
LE: loop exit
PB: predicated region body
PF: predicated region fallthrough
CT: control target
= control target key end

     0   :  { %s1374_s21 = smov 0   ;;  %s1685_s0 = inlined_call_operand.vmem [shape: f32[256,32], index: 0, kind: input, shape index: {}]   ;;  %s1686_s1 = inlined_call_operand.vmem [shape: f32[256,32], index: 1, kind: input, shape index: {}]   ;;  %s1687_s2 = inlined_call_operand.vmem [shape: bf16[128,128], index: 2, kind: input, shape index: {}]   ;;  %s1688_s3 = inlined_call_operand.vmem [shape: f32[1,128], index: 3, kind: input, shape index: {}]   ;;  %s1689_s4 = inlined_call_operand.vmem [shape: bf16[128,16], index: 4, kind: input, shape index: {}]   ;;  %s1690_s5 = inlined_call_operand.vmem [shape: f32[1,16], index: 5, kind: input, shape index: {}]   ;;  %s1691_s6 = inlined_call_operand.vmem [shape: f32[256,16], index: 6, kind: output, shape index: {}]  }
   0x1 LB: > { %s1054_s22 = sadd.s32 4294967295, %s1334_s21   ;;  %p1058_p0 = scmp.ge.s32.totalorder %s1334_s21, 1  ;;  %s1334_s21 = sphi %s1374_s21, %s16_s21  }
   0x2   : > { %p224_p1 = scmp.lt.s32.totalorder %s1334_s21, 3 }
   0x4   : > { %p225_p2 = pnand %p1058_p0, %p224_p1 }
   0x5   : > { %s1059_s23 = sshll.u32 (!%p225_p2), %s1054_s22, 4  ;;  %v1312_v0 = vld [vmem:[%s1687_s2] sm:$0xff] (!%p225_p2)   ;;  %v1313_v1 = vld [vmem:[%s1687_s2 + $0x8] sm:$0xff] (!%p225_p2)   ;;  %v1314_v2 = vld [vmem:[%s1687_s2 + $0x10] sm:$0xff] (!%p225_p2)   ;;  %s1336_s15 = smov (!%p225_p2), 32   ;;  %vm550_vm0 = vcmask (!%p225_p2), 261120  }
   0x6   : > { %228 = sbr.rel (%p225_p2) target bundleno = 625 (0x271), region = 44  ;;  %p260_p3 = scmp.lt.s32.totalorder (!%p225_p2), %s1059_s23, 31  ;;  %1117 = vmatprep.subr.bf16.mxu0 (!%p225_p2), %v1312_v0  ;;  %v1315_v8 = vld [vmem:[%s1687_s2 + $0x18] sm:$0xff] (!%p225_p2)   ;;  %v1316_v34 = vld [vmem:[%s1687_s2 + $0x20] sm:$0xff] (!%p225_p2)   ;;  %v1317_v43 = vld [vmem:[%s1687_s2 + $0x28] sm:$0xff] (!%p225_p2)   ;;  %vm567_vm1 = vcmask (!%p225_p2), 523264  }
   0x7   : > { %1118 = vmatpush3.bf16.msra.mxu0 (!%p225_p2), %v1312_v0  ;;  %s1337_s18 = smov (!%p225_p2), 96   ;;  %s1338_s22 = smov (!%p225_p2), 64   ;;  %v1318_v52 = vld [vmem:[%s1687_s2 + $0x30] sm:$0xff] (!%p225_p2)   ;;  %vm584_vm2 = vcmask (!%p225_p2), 785408   ;;  %vm969_vm3 = vcmask (!%p225_p2), 130048  }
   0x8   : > { %1119 = vmatprep.subr.bf16.mxu0 (!%p225_p2), %v1313_v1 }
   0xb   : > { %1120 = vmatpush3.bf16.msra.mxu0 (!%p225_p2), %v1313_v1  ;;  %v1319_v1 = vld [vmem:[%s1687_s2 + $0x38] sm:$0xff] (!%p225_p2)  }
   0xc   : > { %1121 = vmatprep.subr.bf16.mxu0 (!%p225_p2), %v1314_v2 }
   0xd   : > { %s1693_s23 = smov (!%p260_p3, %s1059_s23), 31 }
   0xe   : > { %s1388_s28 = sshll.u32 %s1693_s23, 3 }
   0xf   : > { %s1397_s9 = scalar_lea.vmem %s1686_s1, %s1388_s28  ;;  %s1409_s12 = scalar_lea.vmem %s1685_s0, %s1388_s28  ;;  %1122 = vmatpush3.bf16.msra.mxu0 %v1314_v2 }
  0x10   : > { %v1400_v3 = vld [vmem:[%s1397_s9 + $0x30] sm:$0xff]  ;;  %v1403_v4 = vld [vmem:[%s1397_s9 + $0x38] sm:$0xff]  ;;  %v294_v6 = vld [vmem:[%s1397_s9] sm:$0xff]  ;;  %1123 = vmatprep.subr.bf16.mxu0 %v1315_v8  ;;  %s1648_s27 = scalar_lea.vmem %s1691_s6, %s1388_s28 }
  0x11   : > { %v1212_v5 = vpack.i.bf16 %v1403_v4, %v1400_v3  ;;  %v295_v7 = vld [vmem:[%s1397_s9 + $0x8] sm:$0xff]  ;;  %v1419_v9 = vld [vmem:[%s1409_s12 + $0x30] sm:$0xff]  ;;  %v1422_v11 = vld [vmem:[%s1409_s12] sm:$0xff] }
  0x12   : > { %v1192_v10 = vpack.i.bf16 %v295_v7, %v294_v6  ;;  %v1425_v12 = vld [vmem:[%s1409_s12 + $0x8] sm:$0xff]  ;;  %v296_v13 = vld [vmem:[%s1397_s9 + $0x10] sm:$0xff]  ;;  %v310_v14 = vsub.f32 %v1422_v11, %v294_v6  ;;  %v297_v16 = vld [vmem:[%s1397_s9 + $0x18] sm:$0xff]  ;;  %v342_v19 = vmul.f32 %v294_v6, %v1422_v11  ;;  %v316_v35 = vsub.f32 %v1419_v9, %v1400_v3 }
  0x13   : > { %1213 = vrot.lane.b32.xlu1 %v1212_v5, %s1336_s15  ;;  %v311_v15 = vsub.f32 %v1425_v12, %v295_v7  ;;  %v1433_v17 = vld [vmem:[%s1409_s12 + $0x10] sm:$0xff]  ;;  %v1436_v18 = vld [vmem:[%s1409_s12 + $0x18] sm:$0xff]  ;;  %v343_v20 = vmul.f32 %v295_v7, %v1425_v12  ;;  %v1197_v22 = vpack.i.bf16 %v297_v16, %v296_v13  ;;  %v298_v25 = vld [vmem:[%s1397_s9 + $0x20] sm:$0xff]  ;;  %1124 = vmatpush3.bf16.msra.mxu0 %v1315_v8 }
  0x14   : > { %v1441_v21 = vld [vmem:[%s1409_s12 + $0x38] sm:$0xff]  ;;  %1193 = vrot.lane.b32.xlu0 %v1192_v10, %s1336_s15  ;;  %v344_v23 = vmul.f32 %v296_v13, %v1433_v17  ;;  %v345_v24 = vmul.f32 %v297_v16, %v1436_v18  ;;  %v312_v26 = vsub.f32 %v1433_v17, %v296_v13  ;;  %v1449_v27 = vld [vmem:[%s1409_s12 + $0x20] sm:$0xff]  ;;  %v326_v28 = vand.u32 2147483647, %v310_v14  ;;  %v299_v30 = vld [vmem:[%s1397_s9 + $0x28] sm:$0xff]  ;;  %1125 = vmatprep.subr.bf16.mxu0 %v1316_v34 }
  0x15   : > { %v327_v29 = vand.u32 2147483647, %v311_v15  ;;  %v1453_v31 = vld [vmem:[%s1409_s12 + $0x28] sm:$0xff]  ;;  %v313_v33 = vsub.f32 %v1436_v18, %v297_v16  ;;  %v317_v36 = vsub.f32 %v1441_v21, %v1403_v4  ;;  %v1202_v37 = vpack.i.bf16 %v343_v20, %v342_v19  ;;  %v302_v50 = vld [vmem:[%s1397_s9 + $0x40] sm:$0xff]  ;;  %v304_v58 = vld [vmem:[%s1397_s9 + $0x50] sm:$0xff] }
  0x16   : > { %v1217_v32 = vpack.i.bf16 %v345_v24, %v344_v23  ;;  %v314_v38 = vsub.f32 %v1449_v27, %v298_v25  ;;  %v328_v40 = vand.u32 2147483647, %v312_v26  ;;  %v315_v42 = vsub.f32 %v1453_v31, %v299_v30  ;;  %v1474_v51 = vld [vmem:[%s1409_s12 + $0x40] sm:$0xff]  ;;  %v303_v57 = vld [vmem:[%s1397_s9 + $0x48] sm:$0xff]  ;;  %v305_v59 = vld [vmem:[%s1397_s9 + $0x58] sm:$0xff] }
  0x17   : > { %v1222_v39 = vpack.i.bf16 %v327_v29, %v326_v28  ;;  %v329_v41 = vand.u32 2147483647, %v313_v33  ;;  %v332_v45 = vand.u32 2147483647, %v316_v35  ;;  %v333_v46 = vand.u32 2147483647, %v317_v36  ;;  %1126 = vmatpush3.bf16.msra.mxu0 %v1316_v34 }
  0x18   : > { %1198 = vrot.lane.b32.xlu0 %v1197_v22, %s1336_s15  ;;  %1218 = vrot.lane.b32.xlu1 %v1217_v32, %s1337_s18  ;;  %v330_v44 = vand.u32 2147483647, %v314_v38  ;;  %v1207_v47 = vpack.i.bf16 %v299_v30, %v298_v25  ;;  %v331_v49 = vand.u32 2147483647, %v315_v42  ;;  %v346_v53 = vmul.f32 %v298_v25, %v1449_v27  ;;  %v1489_v60 = vld [vmem:[%s1409_s12 + $0x48] sm:$0xff]  ;;  %v1492_v61 = vld [vmem:[%s1409_s12 + $0x50] sm:$0xff] }
  0x19   : > { %v1227_v48 = vpack.i.bf16 %v329_v41, %v328_v40  ;;  %1127 = vmatprep.subr.bf16.mxu0 %v1317_v43  ;;  %v347_v54 = vmul.f32 %v299_v30, %v1453_v31  ;;  %v348_v55 = vmul.f32 %v1400_v3, %v1419_v9  ;;  %v349_v56 = vmul.f32 %v1403_v4, %v1441_v21  ;;  %v1497_v0 = vld [vmem:[%s1409_s12 + $0x58] sm:$0xff]  ;;  %v306_v24 = vld [vmem:[%s1397_s9 + $0x60] sm:$0xff]  ;;  %v307_v25 = vld [vmem:[%s1397_s9 + $0x68] sm:$0xff] }
  0x1a   : > { %v1232_v62 = vpack.i.bf16 %v331_v49, %v330_v44  ;;  %v1237_v63 = vpack.i.bf16 %v333_v46, %v332_v45  ;;  %v318_v4 = vsub.f32 %v1474_v51, %v302_v50  ;;  %v319_v5 = vsub.f32 %v1489_v60, %v303_v57  ;;  %v308_v26 = vld [vmem:[%s1397_s9 + $0x70] sm:$0xff]  ;;  %v309_v30 = vld [vmem:[%s1397_s9 + $0x78] sm:$0xff]  ;;  %v1521_v32 = vld [vmem:[%s1409_s12 + $0x60] sm:$0xff] }
  0x1b   : > { %1128 = vmatpush3.bf16.msra.mxu0 %v1317_v43  ;;  %v1242_v2 = vpack.i.bf16 %v347_v54, %v346_v53  ;;  %v1247_v3 = vpack.i.bf16 %v349_v56, %v348_v55  ;;  %v320_v6 = vsub.f32 %v1492_v61, %v304_v58  ;;  %v321_v7 = vsub.f32 %v1497_v0, %v305_v59  ;;  %v1524_v33 = vld [vmem:[%s1409_s12 + $0x68] sm:$0xff]  ;;  %v1527_v34 = vld [vmem:[%s1409_s12 + $0x70] sm:$0xff]  ;;  %v1530_v35 = vld [vmem:[%s1409_s12 + $0x78] sm:$0xff] }
  0x1c   : > { %1203 = vrot.lane.b32.xlu0 %v1202_v37, %s1337_s18  ;;  %1223 = vrot.lane.b32.xlu1 %v1222_v39, %s1338_s22  ;;  %v1252_v8 = vpack.i.bf16 %v303_v57, %v302_v50  ;;  %v334_v10 = vand.u32 2147483647, %v318_v4  ;;  %v1257_v13 = vpack.i.bf16 %v305_v59, %v304_v58  ;;  %v335_v14 = vand.u32 2147483647, %v319_v5  ;;  %v1320_v55 = vld [vmem:[%s1689_s4] sm:$0xff]   ;;  %v1321_v56 = vld [vmem:[%s1689_s4 + $0x8] sm:$0xff]  }
  0x1d   : > { %1129 = vmatprep.subr.bf16.mxu0 %v1318_v52  ;;  %v336_v15 = vand.u32 2147483647, %v320_v6  ;;  %v337_v16 = vand.u32 2147483647, %v321_v7  ;;  %v350_v19 = vmul.f32 %v302_v50, %v1474_v51  ;;  %v351_v20 = vmul.f32 %v303_v57, %v1489_v60  ;;  %1149 = vmatprep.subr.bf16.mxu1 %v1320_v55 }
  0x1e   : > { %v352_v22 = vmul.f32 %v304_v58, %v1492_v61  ;;  %v353_v23 = vmul.f32 %v305_v59, %v1497_v0  ;;  %v1262_v28 = vpack.i.bf16 %v335_v14, %v334_v10  ;;  %v322_v38 = vsub.f32 %v1521_v32, %v306_v24  ;;  %1150 = vmatpush3.bf16.msra.mxu1 %v1320_v55  ;;  %v1322_v59 = vld [vmem:[%s1689_s4 + $0x10] sm:$0xff]  }
  0x1f   : > { %1130 = vmatpush3.bf16.msra.mxu0 %v1318_v52  ;;  %v1267_v29 = vpack.i.bf16 %v337_v16, %v336_v15  ;;  %v1272_v36 = vpack.i.bf16 %v351_v20, %v350_v19  ;;  %v323_v39 = vsub.f32 %v1524_v33, %v307_v25  ;;  %v324_v40 = vsub.f32 %v1527_v34, %v308_v26 }
  0x20   : > { %1208 = vrot.lane.b32.xlu0 %v1207_v47, %s1336_s15  ;;  %1228 = vrot.lane.b32.xlu1 %v1227_v48, %s1338_s22  ;;  %v1277_v37 = vpack.i.bf16 %v353_v23, %v352_v22  ;;  %v325_v41 = vsub.f32 %v1530_v35, %v309_v30  ;;  %v1282_v42 = vpack.i.bf16 %v307_v25, %v306_v24  ;;  %v338_v43 = vand.u32 2147483647, %v322_v38 }
  0x21   : > { %1131 = vmatprep.subr.bf16.mxu0 %v1319_v1  ;;  %v1287_v44 = vpack.i.bf16 %v309_v30, %v308_v26  ;;  %v339_v45 = vand.u32 2147483647, %v323_v39  ;;  %v340_v46 = vand.u32 2147483647, %v324_v40  ;;  %v354_v48 = vmul.f32 %v306_v24, %v1521_v32  ;;  %1151 = vmatprep.subr.bf16.mxu1 %v1321_v56 }
  0x22   : > { %v341_v47 = vand.u32 2147483647, %v325_v41  ;;  %v355_v49 = vmul.f32 %v307_v25, %v1524_v33  ;;  %v356_v50 = vmul.f32 %v308_v26, %v1527_v34  ;;  %v357_v54 = vmul.f32 %v309_v30, %v1530_v35  ;;  %1152 = vmatpush3.bf16.msra.mxu1 %v1321_v56 }
  0x23   : > { %1132 = vmatpush3.bf16.msra.mxu0 %v1319_v1  ;;  %v1292_v52 = vpack.i.bf16 %v339_v45, %v338_v43  ;;  %1153 = vmatprep.subr.bf16.mxu1 %v1322_v59  ;;  %v1325_v1 = vld [vmem:[%s1689_s4 + $0x28] sm:$0xff]  }
  0x24   : > { %1233 = vrot.lane.b32.xlu0 %v1232_v62, %s1338_s22  ;;  %1238 = vrot.lane.b32.xlu1 %v1237_v63, %s1338_s22  ;;  %v1297_v53 = vpack.i.bf16 %v341_v47, %v340_v46  ;;  %v1302_v57 = vpack.i.bf16 %v355_v49, %v354_v48  ;;  %v1307_v58 = vpack.i.bf16 %v357_v54, %v356_v50  ;;  %v1323_v62 = vld [vmem:[%s1689_s4 + $0x18] sm:$0xff]   ;;  %v1324_v63 = vld [vmem:[%s1689_s4 + $0x20] sm:$0xff]  }
  0x26   : > { %1154 = vmatpush3.bf16.msra.mxu1 %v1322_v59 }
  0x27   : > { %1155 = vmatprep.subr.bf16.mxu1 %v1323_v62 }
  0x28   : > { %1243 = vrot.lane.b32.xlu0 %v1242_v2, %s1337_s18  ;;  %1248 = vrot.lane.b32.xlu1 %v1247_v3, %s1337_s18 }
  0x2a   : > { %1156 = vmatpush3.bf16.msra.mxu1 %v1323_v62 }
  0x2b   : > { %1157 = vmatprep.subr.bf16.mxu1 %v1324_v63 }
  0x2c   : > { %1253 = vrot.lane.b32.xlu0 %v1252_v8, %s1336_s15  ;;  %1258 = vrot.lane.b32.xlu1 %v1257_v13, %s1336_s15 }
  0x2e   : > { %1158 = vmatpush3.bf16.msra.mxu1 %v1324_v63 }
  0x2f   : > { %1159 = vmatprep.subr.bf16.mxu1 %v1325_v1 }
  0x30   : > { %1263 = vrot.lane.b32.xlu0 %v1262_v28, %s1338_s22  ;;  %1268 = vrot.lane.b32.xlu1 %v1267_v29, %s1338_s22 }
  0x32   : > { %1160 = vmatpush3.bf16.msra.mxu1 %v1325_v1 }
  0x34   : > { %1273 = vrot.lane.b32.xlu0 %v1272_v36, %s1337_s18  ;;  %1278 = vrot.lane.b32.xlu1 %v1277_v37, %s1337_s18 }
  0x38   : > { %1283 = vrot.lane.b32.xlu0 %v1282_v42, %s1336_s15  ;;  %1288 = vrot.lane.b32.xlu1 %v1287_v44, %s1336_s15 }
  0x3c   : > { %1293 = vrot.lane.b32.xlu0 %v1292_v52, %s1338_s22  ;;  %1298 = vrot.lane.b32.xlu1 %v1297_v53, %s1338_s22 }
  0x40   : > { %1303 = vrot.lane.b32.xlu0 %v1302_v57, %s1337_s18  ;;  %1308 = vrot.lane.b32.xlu1 %v1307_v58, %s1337_s18 }
  0x85   : > { %v1214_v2 = vpop.permute.xlu1 %1213 }
  0x86   : > { %v1194_v3 = vpop.permute.xlu0 %1193  ;;  %v1216_v41 = vunpack.i.h.bf16 %v1214_v2  ;;  %v1215_v42 = vunpack.i.l.bf16 %v1214_v2 }
  0x87   : > { %v1196_v6 = vunpack.i.h.bf16 %v1194_v3  ;;  %v1195_v7 = vunpack.i.l.bf16 %v1194_v3 }
  0x88   : > { %v557_v55 = vsel %vm550_vm0, %v1419_v9, %v1215_v42  ;;  %v558_v56 = vsel %vm550_vm0, %v1441_v21, %v1216_v41 }
  0x89   : > { %v551_v22 = vsel %vm550_vm0, %v1422_v11, %v1195_v7  ;;  %v552_v23 = vsel %vm550_vm0, %v1425_v12, %v1196_v6 }
  0x8a   : > { %v1199_v4 = vpop.permute.xlu0 %1198  ;;  %v1219_v5 = vpop.permute.xlu1 %1218 }
  0x8b   : > { %v1201_v19 = vunpack.i.h.bf16 %v1199_v4  ;;  %v1200_v20 = vunpack.i.l.bf16 %v1199_v4  ;;  %v1221_v36 = vunpack.i.h.bf16 %v1219_v5  ;;  %v1220_v12 = vunpack.i.l.bf16 %v1219_v5 }
  0x8d   : > { %v553_v39 = vsel %vm550_vm0, %v1433_v17, %v1200_v20  ;;  %v554_v11 = vsel %vm550_vm0, %v1436_v18, %v1201_v19 }
  0x8e   : > { %v1204_v8 = vpop.permute.xlu0 %1203  ;;  %v1224_v10 = vpop.permute.xlu1 %1223 }
  0x8f   : > { %v1206_v13 = vunpack.i.h.bf16 %v1204_v8  ;;  %v1205_v14 = vunpack.i.l.bf16 %v1204_v8  ;;  %v1226_v15 = vunpack.i.h.bf16 %v1224_v10  ;;  %v1225_v16 = vunpack.i.l.bf16 %v1224_v10 }
  0x91   : > { %v568_v24 = vsel %vm567_vm1, %v551_v22, %v1225_v16  ;;  %v569_v25 = vsel %vm567_vm1, %v552_v23, %v1226_v15 }
  0x92   : > { %v1209_v26 = vpop.permute.xlu0 %1208  ;;  %v1229_v28 = vpop.permute.xlu1 %1228  ;;  %v585_v29 = vsel %vm584_vm2, %v568_v24, %v1205_v14  ;;  %v586_v30 = vsel %vm584_vm2, %v569_v25, %v1206_v13 }
  0x93   : > { %v1231_v37 = vunpack.i.h.bf16 %v1229_v28  ;;  %v1230_v38 = vunpack.i.l.bf16 %v1229_v28  ;;  %v601_v40 = vpack.c.bf16 %v586_v30, %v585_v29  ;;  %v1211_v45 = vunpack.i.h.bf16 %v1209_v26 }
  0x94   : > { %v1210_v46 = vunpack.i.l.bf16 %v1209_v26 }
  0x95   : > { %v571_v43 = vsel %vm567_vm1, %v554_v11, %v1231_v37  ;;  %v570_v44 = vsel %vm567_vm1, %v553_v39, %v1230_v38  ;;  %1133 = vmatprep.mubr.bf16.mxu0 %v601_v40  ;;  %v556_v57 = vsel %vm550_vm0, %v1453_v31, %v1211_v45 }
  0x96   : > { %v1234_v47 = vpop.permute.xlu0 %1233  ;;  %v1239_v48 = vpop.permute.xlu1 %1238  ;;  %v587_v49 = vsel %vm584_vm2, %v570_v44, %v1220_v12  ;;  %v588_v17 = vsel %vm584_vm2, %v571_v43, %v1221_v36  ;;  %v555_v58 = vsel %vm550_vm0, %v1449_v27, %v1210_v46 }
  0x97   : > { %v1236_v50 = vunpack.i.h.bf16 %v1234_v47  ;;  %v1235_v52 = vunpack.i.l.bf16 %v1234_v47  ;;  %v1241_v18 = vunpack.i.h.bf16 %v1239_v48  ;;  %v1240_v53 = vunpack.i.l.bf16 %v1239_v48 }
  0x98   : > { %v602_v54 = vpack.c.bf16 %v588_v17, %v587_v49 }
  0x99   : > { %v572_v4 = vsel %vm567_vm1, %v555_v58, %v1235_v52  ;;  %v573_v9 = vsel %vm567_vm1, %v556_v57, %v1236_v50  ;;  %v575_v5 = vsel %vm567_vm1, %v558_v56, %v1241_v18  ;;  %v574_v21 = vsel %vm567_vm1, %v557_v55, %v1240_v53 }
  0x9a   : > { %1134 = vmatmul.mubr.bf16.vlgmr.msra.gmra.mrb[0].mxu0 %v602_v54  ;;  %v1244_v59 = vpop.permute.xlu0 %1243  ;;  %v1249_v62 = vpop.permute.xlu1 %1248 }
  0x9b   : > { %v1246_v63 = vunpack.i.h.bf16 %v1244_v59  ;;  %v1245_v1 = vunpack.i.l.bf16 %v1244_v59  ;;  %v1251_v2 = vunpack.i.h.bf16 %v1249_v62  ;;  %v1250_v3 = vunpack.i.l.bf16 %v1249_v62 }
  0x9d   : > { %v589_v31 = vsel %vm584_vm2, %v572_v4, %v1245_v1  ;;  %v590_v6 = vsel %vm584_vm2, %v573_v9, %v1246_v63  ;;  %v591_v27 = vsel %vm584_vm2, %v574_v21, %v1250_v3  ;;  %v592_v7 = vsel %vm584_vm2, %v575_v5, %v1251_v2 }
  0x9e   : > { %v1254_v8 = vpop.permute.xlu0 %1253  ;;  %v1259_v10 = vpop.permute.xlu1 %1258  ;;  %v603_v13 = vpack.c.bf16 %v590_v6, %v589_v31  ;;  %v604_v14 = vpack.c.bf16 %v592_v7, %v591_v27 }
  0x9f   : > { %v1256_v15 = vunpack.i.h.bf16 %v1254_v8  ;;  %v1255_v16 = vunpack.i.l.bf16 %v1254_v8  ;;  %v1261_v19 = vunpack.i.h.bf16 %v1259_v10  ;;  %v1260_v20 = vunpack.i.l.bf16 %v1259_v10 }
  0xa0   : > { %1137 = vmatprep.mubr.bf16.mxu0 %v603_v13  ;;  %v1326_v13 = vld [vmem:[%s1689_s4 + $0x30] sm:$0xff]  }
  0xa1   : > { %v560_v29 = vsel %vm550_vm0, %v1489_v60, %v1256_v15  ;;  %v559_v30 = vsel %vm550_vm0, %v1474_v51, %v1255_v16  ;;  %v562_v36 = vsel %vm550_vm0, %v1497_v0, %v1261_v19  ;;  %v561_v37 = vsel %vm550_vm0, %v1492_v61, %v1260_v20  ;;  %1161 = vmatprep.subr.bf16.mxu1 %v1326_v13  ;;  %v1065_v15 = vld [vmem:[%s1688_s3] ss:$0 sm:$0xff] }
  0xa2   : > { %1138 = vmatmul.mubr.bf16.gmra.mrb[4].mxu0 %v604_v14  ;;  %v1264_v22 = vpop.permute.xlu0 %1263  ;;  %v1269_v23 = vpop.permute.xlu1 %1268  ;;  %1162 = vmatpush3.bf16.msra.mxu1 %v1326_v13  ;;  %v1327_v14 = vld [vmem:[%s1689_s4 + $0x38] sm:$0xff]  }
  0xa3   : > { %v1266_v24 = vunpack.i.h.bf16 %v1264_v22  ;;  %v1265_v25 = vunpack.i.l.bf16 %v1264_v22  ;;  %v1271_v26 = vunpack.i.h.bf16 %v1269_v23  ;;  %v1270_v28 = vunpack.i.l.bf16 %v1269_v23  ;;  %1163 = vmatprep.subr.bf16.mxu1 %v1327_v14 }
  0xa5   : > { %v576_v42 = vsel %vm567_vm1, %v559_v30, %v1265_v25  ;;  %v577_v43 = vsel %vm567_vm1, %v560_v29, %v1266_v24  ;;  %v578_v60 = vsel %vm567_vm1, %v561_v37, %v1270_v28  ;;  %v579_v51 = vsel %vm567_vm1, %v562_v36, %v1271_v26 }
  0xa6   : > { %v1274_v38 = vpop.permute.xlu0 %1273  ;;  %v1279_v39 = vpop.permute.xlu1 %1278  ;;  %1164 = vmatpush3.bf16.msra.mxu1 %v1327_v14 }
  0xa7   : > { %v1276_v11 = vunpack.i.h.bf16 %v1274_v38  ;;  %v1275_v12 = vunpack.i.l.bf16 %v1274_v38  ;;  %v1281_v40 = vunpack.i.h.bf16 %v1279_v39  ;;  %v1280_v41 = vunpack.i.l.bf16 %v1279_v39 }
  0xa9   : > { %v593_v44 = vsel %vm584_vm2, %v576_v42, %v1275_v12  ;;  %v594_v0 = vsel %vm584_vm2, %v577_v43, %v1276_v11  ;;  %v595_v61 = vsel %vm584_vm2, %v578_v60, %v1280_v41  ;;  %v596_v45 = vsel %vm584_vm2, %v579_v51, %v1281_v40 }
  0xaa   : > { %v1284_v46 = vpop.permute.xlu0 %1283  ;;  %v1289_v47 = vpop.permute.xlu1 %1288  ;;  %v605_v48 = vpack.c.bf16 %v594_v0, %v593_v44  ;;  %v606_v49 = vpack.c.bf16 %v596_v45, %v595_v61 }
  0xab   : > { %v1286_v17 = vunpack.i.h.bf16 %v1284_v46  ;;  %v1285_v50 = vunpack.i.l.bf16 %v1284_v46  ;;  %v1291_v52 = vunpack.i.h.bf16 %v1289_v47  ;;  %v1290_v18 = vunpack.i.l.bf16 %v1289_v47 }
  0xac   : > { %1141 = vmatprep.mubr.bf16.mxu0 %v605_v48 }
  0xad   : > { %1142 = vmatmul.mubr.bf16.gmra.mrb[8].mxu0 %v606_v49  ;;  %v564_v59 = vsel %vm550_vm0, %v1524_v33, %v1286_v17  ;;  %v563_v62 = vsel %vm550_vm0, %v1521_v32, %v1285_v50  ;;  %v566_v63 = vsel %vm550_vm0, %v1530_v35, %v1291_v52  ;;  %v565_v1 = vsel %vm550_vm0, %v1527_v34, %v1290_v18 }
  0xae   : > { %v1294_v53 = vpop.permute.xlu0 %1293  ;;  %v1299_v54 = vpop.permute.xlu1 %1298 }
  0xaf   : > { %v1296_v55 = vunpack.i.h.bf16 %v1294_v53  ;;  %v1295_v56 = vunpack.i.l.bf16 %v1294_v53  ;;  %v1301_v57 = vunpack.i.h.bf16 %v1299_v54  ;;  %v1300_v58 = vunpack.i.l.bf16 %v1299_v54 }
  0xb1   : > { %v580_v31 = vsel %vm567_vm1, %v563_v62, %v1295_v56  ;;  %v581_v6 = vsel %vm567_vm1, %v564_v59, %v1296_v55  ;;  %v582_v33 = vsel %vm567_vm1, %v565_v1, %v1300_v58  ;;  %v583_v32 = vsel %vm567_vm1, %v566_v63, %v1301_v57 }
  0xb2   : > { %v1304_v2 = vpop.permute.xlu0 %1303  ;;  %v1309_v3 = vpop.permute.xlu1 %1308 }
  0xb3   : > { %v1306_v4 = vunpack.i.h.bf16 %v1304_v2  ;;  %v1305_v9 = vunpack.i.l.bf16 %v1304_v2  ;;  %v1311_v5 = vunpack.i.h.bf16 %v1309_v3  ;;  %v1310_v21 = vunpack.i.l.bf16 %v1309_v3 }
  0xb5   : > { %v597_v27 = vsel %vm584_vm2, %v580_v31, %v1305_v9  ;;  %v598_v35 = vsel %vm584_vm2, %v581_v6, %v1306_v4  ;;  %v599_v34 = vsel %vm584_vm2, %v582_v33, %v1310_v21  ;;  %v600_v7 = vsel %vm584_vm2, %v583_v32, %v1311_v5 }
  0xb6   : > { %v607_v8 = vpack.c.bf16 %v598_v35, %v597_v27  ;;  %v608_v10 = vpack.c.bf16 %v600_v7, %v599_v34  ;;  %v1074_v35 = vld [vmem:[%s1690_s5] ss:$0 sm:$0xff] }
  0xb8   : > { %1145 = vmatprep.mubr.bf16.mxu0 %v607_v8 }
  0xb9   : > { %1146 = vmatmul.mubr.bf16.gmra.mrb[12].mxu0 %v608_v10 }
 0x16d   : > { %v1135_v16 = vpop.f32.mrb[0].mxu0 }
 0x16e   : > { %v723_v19 = vadd.f32 %v1135_v16, %v1065_v15  ;;  %v714_v20 = vpop.f32.mrb[1].mxu0 }
 0x16f   : > { %v715_v22 = vadd.f32 %v1065_v15, %v714_v20  ;;  %v1136_v23 = vpop.f32.mrb[2].mxu0 }
 0x170   : > { %v726_v24 = vadd.f32 %v1136_v23, %v1065_v15  ;;  %v717_v25 = vpop.f32.mrb[3].mxu0  ;;  %v779_v28 = vmax.f32 %v723_v19, 0.0 }
 0x171   : > { %v718_v26 = vadd.f32 %v1065_v15, %v717_v25  ;;  %v777_v30 = vmax.f32 %v715_v22, 0.0 }
 0x172   : > { %v780_v29 = vmax.f32 %v726_v24, 0.0 }
 0x173   : > { %v778_v36 = vmax.f32 %v718_v26, 0.0 }
 0x174   : > { %v794_v37 = vpack.c.bf16 %v780_v29, %v779_v28 }
 0x175   : > { %v1139_v38 = vpop.f32.mrb[4].mxu0  ;;  %v793_v39 = vpack.c.bf16 %v778_v36, %v777_v30 }
 0x176   : > { %v739_v11 = vadd.f32 %v1139_v38, %v1065_v15  ;;  %v730_v12 = vpop.f32.mrb[5].mxu0 }
 0x177   : > { %v731_v40 = vadd.f32 %v1065_v15, %v730_v12  ;;  %v1140_v41 = vpop.f32.mrb[6].mxu0  ;;  %1165 = vmatprep.mubr.bf16.mxu1 %v793_v39 }
 0x178   : > { %v742_v42 = vadd.f32 %v1140_v41, %v1065_v15  ;;  %v733_v43 = vpop.f32.mrb[7].mxu0  ;;  %1166 = vmatmul.mubr.bf16.vlgmr.msra.gmra.mrb[0].mxu1 %v794_v37  ;;  %v783_v51 = vmax.f32 %v739_v11, 0.0 }
 0x179   : > { %v734_v60 = vadd.f32 %v1065_v15, %v733_v43  ;;  %v781_v0 = vmax.f32 %v731_v40, 0.0 }
 0x17a   : > { %v784_v44 = vmax.f32 %v742_v42, 0.0 }
 0x17b   : > { %v782_v61 = vmax.f32 %v734_v60, 0.0 }
 0x17c   : > { %v796_v45 = vpack.c.bf16 %v784_v44, %v783_v51 }
 0x17d   : > { %v795_v46 = vpack.c.bf16 %v782_v61, %v781_v0 }
 0x17f   : > { %1169 = vmatprep.mubr.bf16.mxu1 %v795_v46 }
 0x180   : > { %1170 = vmatmul.mubr.bf16.gmra.mrb[4].mxu1 %v796_v45  ;;  %v1143_v47 = vpop.f32.mrb[8].mxu0 }
 0x181   : > { %v755_v48 = vadd.f32 %v1143_v47, %v1065_v15  ;;  %v746_v49 = vpop.f32.mrb[9].mxu0 }
 0x182   : > { %v747_v17 = vadd.f32 %v1065_v15, %v746_v49  ;;  %v1144_v50 = vpop.f32.mrb[10].mxu0 }
 0x183   : > { %v758_v52 = vadd.f32 %v1144_v50, %v1065_v15  ;;  %v749_v18 = vpop.f32.mrb[11].mxu0  ;;  %v787_v54 = vmax.f32 %v755_v48, 0.0 }
 0x184   : > { %v750_v53 = vadd.f32 %v1065_v15, %v749_v18  ;;  %v785_v56 = vmax.f32 %v747_v17, 0.0 }
 0x185   : > { %v788_v55 = vmax.f32 %v758_v52, 0.0 }
 0x186   : > { %v786_v57 = vmax.f32 %v750_v53, 0.0 }
 0x187   : > { %v798_v58 = vpack.c.bf16 %v788_v55, %v787_v54 }
 0x188   : > { %v797_v59 = vpack.c.bf16 %v786_v57, %v785_v56 }
 0x18a   : > { %1173 = vmatprep.mubr.bf16.mxu1 %v797_v59 }
 0x18b   : > { %1174 = vmatmul.mubr.bf16.gmra.mrb[8].mxu1 %v798_v58 }
 0x18c   : > { %v1147_v62 = vpop.f32.mrb[12].mxu0 }
 0x18d   : > { %v771_v63 = vadd.f32 %v1147_v62, %v1065_v15  ;;  %v762_v1 = vpop.f32.mrb[13].mxu0 }
 0x18e   : > { %v763_v2 = vadd.f32 %v1065_v15, %v762_v1  ;;  %v1148_v3 = vpop.f32.mrb[14].mxu0 }
 0x18f   : > { %v774_v4 = vadd.f32 %v1148_v3, %v1065_v15  ;;  %v765_v9 = vpop.f32.mrb[15].mxu0  ;;  %v791_v21 = vmax.f32 %v771_v63, 0.0 }
 0x190   : > { %v766_v5 = vadd.f32 %v1065_v15, %v765_v9  ;;  %v789_v6 = vmax.f32 %v763_v2, 0.0 }
 0x191   : > { %v792_v31 = vmax.f32 %v774_v4, 0.0 }
 0x192   : > { %v790_v33 = vmax.f32 %v766_v5, 0.0 }
 0x193   : > { %v800_v32 = vpack.c.bf16 %v792_v31, %v791_v21 }
 0x194   : > { %v799_v27 = vpack.c.bf16 %v790_v33, %v789_v6 }
 0x196   : > { %1177 = vmatprep.mubr.bf16.mxu1 %v799_v27 }
 0x197   : > { %1178 = vmatmul.mubr.bf16.gmra.mrb[12].mxu1 %v800_v32 }
 0x24b   : > { %v1167_v34 = vpop.f32.mrb[0].mxu1 }
 0x24c   : > { %v915_v7 = vadd.f32 %v1167_v34, %v1074_v35  ;;  %v906_v8 = vpop.f32.mrb[1].mxu1 }
 0x24d   : > { %v907_v10 = vadd.f32 %v1074_v35, %v906_v8  ;;  %v1168_v13 = vpop.f32.mrb[2].mxu1 }
 0x24e   : > { %972 = vst.msk [vmem:[%s1648_s27 + $0x10] sm:$0xff] %vm969_vm3, %v915_v7  ;;  %v918_v14 = vadd.f32 %v1168_v13, %v1074_v35  ;;  %v909_v15 = vpop.f32.mrb[3].mxu1 }
 0x24f   : > { %970 = vst.msk [vmem:[%s1648_s27] sm:$0xff] %vm969_vm3, %v907_v10  ;;  %v910_v16 = vadd.f32 %v1074_v35, %v909_v15 }
 0x250   : > { %973 = vst.msk [vmem:[%s1648_s27 + $0x18] sm:$0xff] %vm969_vm3, %v918_v14 }
 0x251   : > { %971 = vst.msk [vmem:[%s1648_s27 + $0x8] sm:$0xff] %vm969_vm3, %v910_v16 }
 0x253   : > { %v1171_v19 = vpop.f32.mrb[4].mxu1 }
 0x254   : > { %v931_v20 = vadd.f32 %v1171_v19, %v1074_v35  ;;  %v922_v22 = vpop.f32.mrb[5].mxu1 }
 0x255   : > { %v923_v23 = vadd.f32 %v1074_v35, %v922_v22  ;;  %v1172_v24 = vpop.f32.mrb[6].mxu1 }
 0x256   : > { %976 = vst.msk [vmem:[%s1648_s27 + $0x30] sm:$0xff] %vm969_vm3, %v931_v20  ;;  %v934_v25 = vadd.f32 %v1172_v24, %v1074_v35  ;;  %v925_v26 = vpop.f32.mrb[7].mxu1 }
 0x257   : > { %974 = vst.msk [vmem:[%s1648_s27 + $0x20] sm:$0xff] %vm969_vm3, %v923_v23  ;;  %v926_v28 = vadd.f32 %v1074_v35, %v925_v26 }
 0x258   : > { %977 = vst.msk [vmem:[%s1648_s27 + $0x38] sm:$0xff] %vm969_vm3, %v934_v25 }
 0x259   : > { %975 = vst.msk [vmem:[%s1648_s27 + $0x28] sm:$0xff] %vm969_vm3, %v926_v28 }
 0x25e   : > { %v1175_v29 = vpop.f32.mrb[8].mxu1 }
 0x25f   : > { %v947_v30 = vadd.f32 %v1175_v29, %v1074_v35  ;;  %v938_v36 = vpop.f32.mrb[9].mxu1 }
 0x260   : > { %v939_v37 = vadd.f32 %v1074_v35, %v938_v36  ;;  %v1176_v38 = vpop.f32.mrb[10].mxu1 }
 0x261   : > { %980 = vst.msk [vmem:[%s1648_s27 + $0x50] sm:$0xff] %vm969_vm3, %v947_v30  ;;  %v950_v39 = vadd.f32 %v1176_v38, %v1074_v35  ;;  %v941_v11 = vpop.f32.mrb[11].mxu1 }
 0x262   : > { %978 = vst.msk [vmem:[%s1648_s27 + $0x40] sm:$0xff] %vm969_vm3, %v939_v37  ;;  %v942_v12 = vadd.f32 %v1074_v35, %v941_v11 }
 0x263   : > { %981 = vst.msk [vmem:[%s1648_s27 + $0x58] sm:$0xff] %vm969_vm3, %v950_v39 }
 0x264   : > { %979 = vst.msk [vmem:[%s1648_s27 + $0x48] sm:$0xff] %vm969_vm3, %v942_v12 }
 0x26a   : > { %v1179_v40 = vpop.f32.mrb[12].mxu1 }
 0x26b   : > { %v963_v41 = vadd.f32 %v1179_v40, %v1074_v35  ;;  %v954_v42 = vpop.f32.mrb[13].mxu1 }
 0x26c   : > { %v955_v43 = vadd.f32 %v1074_v35, %v954_v42  ;;  %v1180_v60 = vpop.f32.mrb[14].mxu1 }
 0x26d   : > { %984 = vst.msk [vmem:[%s1648_s27 + $0x70] sm:$0xff] %vm969_vm3, %v963_v41  ;;  %v966_v51 = vadd.f32 %v1180_v60, %v1074_v35  ;;  %v957_v44 = vpop.f32.mrb[15].mxu1 }
 0x26e   : > { %982 = vst.msk [vmem:[%s1648_s27 + $0x60] sm:$0xff] %vm969_vm3, %v955_v43  ;;  %v958_v0 = vadd.f32 %v1074_v35, %v957_v44 }
 0x26f   : > { %985 = vst.msk [vmem:[%s1648_s27 + $0x78] sm:$0xff] %vm969_vm3, %v966_v51 }
 0x270   : > { %983 = vst.msk [vmem:[%s1648_s27 + $0x68] sm:$0xff] %vm969_vm3, %v958_v0 }
 0x271 PF: > { %s16_s21 = sadd.s32 1, %s1334_s21  }
 0x272   : > { %p13_p4 = scmp.ge.s32.totalorder %s16_s21, 4  }
 0x274   :  { %15 = sbr.rel (!%p13_p4) target bundleno = 1 (0x1), region = 77 }

</bundles_post_ra>
